<compile_context>
chip_gen: v7x
topology: tpu7x:2x2x1
jax: 0.10.0
libtpu: 0.0.40
codegen_flags: <defaults>
</compile_context>

<pallas_src>
import jax
import jax.numpy as jnp
from jax.experimental import pallas as pl
from jax.experimental.pallas import tpu as pltpu


def mlp_kernel(x_ref, w1_ref, b1_ref, w2_ref, b2_ref, o_ref):
    # x: (bm, D) VMEM, w1: (D, 2) VMEM, b1: (2,) SMEM, w2: (2,) SMEM,
    # b2: (1,) SMEM, o: (bm, 1) VMEM.

    # Layer 1 on the MXU: (bm, D) @ (D, 2) -> (bm, 2), f32 accumulate.
    h = jnp.dot(x_ref[...], w1_ref[...], preferred_element_type=jnp.float32)

    # Bias + ReLU on the VPU; biases are SMEM scalars.
    h0 = jnp.maximum(h[:, 0:1] + b1_ref[0], 0.0)
    h1 = jnp.maximum(h[:, 1:2] + b1_ref[1], 0.0)

    # Layer 2 (K=2, N=1) as a VPU expression — avoids a serialized MXU
    # push/pop round trip for ~4B flops.
    out = h0 * w2_ref[0] + h1 * w2_ref[1] + b2_ref[0]

    o_ref[...] = out.astype(o_ref.dtype)


def net_forward(x, w1, b1, w2, b2, *, bm=512):
    """Forward pass of Net.

    x : (B, D) float32
    w1: (D, 2) float32   (transposed vs. torch layer1.weight)
    b1: (2,)   float32
    w2: (2,)   float32   (flattened layer2.weight)
    b2: (1,)   float32
    Returns (B, 1) float32.
    """
    B, D = x.shape

    # Pick the batch tile: full batch if small, otherwise `bm` rows
    # (multiple of 8 for the sublane tile).
    if B <= bm:
        bm_eff = B
    else:
        bm_eff = (bm // 8) * 8

    # Pad the batch so it divides evenly into tiles; padded rows are discarded.
    n_tiles = pl.cdiv(B, bm_eff)
    Bp = n_tiles * bm_eff
    if Bp != B:
        x = jnp.pad(x, ((0, Bp - B), (0, 0)))

    out = pl.pallas_call(
        mlp_kernel,
        out_shape=jax.ShapeDtypeStruct((Bp, 1), x.dtype),
        grid_spec=pltpu.PrefetchScalarGridSpec(
            num_scalar_prefetch=0,
            grid=(n_tiles,),
            in_specs=[
                # x: streamed batch tiles (double-buffered by Pallas).
                pl.BlockSpec((bm_eff, D), lambda i: (i, 0)),
                # w1: resident in VMEM for every grid step.
                pl.BlockSpec((D, 2), lambda i: (0, 0)),
                # Tiny bias / second-layer weights live in SMEM as scalars.
                pl.BlockSpec(memory_space=pltpu.SMEM),   # b1 (2,)
                pl.BlockSpec(memory_space=pltpu.SMEM),   # w2 (2,)
                pl.BlockSpec(memory_space=pltpu.SMEM),   # b2 (1,)
            ],
            out_specs=pl.BlockSpec((bm_eff, 1), lambda i: (i, 0)),
        ),
        compiler_params=pltpu.CompilerParams(
            dimension_semantics=("parallel",),   # shard batch across TCs (v7x)
        ),
    )(x, w1, b1, w2, b2)

    return out[:B]


def init_params(input_size, key):
    """Deterministic init mimicking nn.Linear's U(-1/sqrt(fan_in), +1/sqrt(fan_in))."""
    k1, k2, k3, k4 = jax.random.split(key, 4)
    bound1 = 1.0 / (input_size ** 0.5)
    w1 = jax.random.uniform(k1, (input_size, 2), jnp.float32, -bound1, bound1)
    b1 = jax.random.uniform(k2, (2,), jnp.float32, -bound1, bound1)
    bound2 = 1.0 / (2 ** 0.5)
    w2 = jax.random.uniform(k3, (2,), jnp.float32, -bound2, bound2)
    b2 = jax.random.uniform(k4, (1,), jnp.float32, -bound2, bound2)
    return w1, b1, w2, b2


def _reference(x, w1, b1, w2, b2):
    h = jnp.maximum(x @ w1 + b1[None, :], 0.0)
    return h @ w2.reshape(2, 1) + b2[None, :]


if __name__ == "__main__":
    key = jax.random.PRNGKey(0)
    k_x, k_p, k_x2 = jax.random.split(key, 3)

    # --- small case matching the module spec (single block, grid of 1) ---
    batch, input_size = 8, 32
    x = jax.random.normal(k_x, (batch, input_size), jnp.float32)
    w1, b1, w2, b2 = init_params(input_size, k_p)

    out = net_forward(x, w1, b1, w2, b2)
    jax.block_until_ready(out)
    ref = _reference(x, w1, b1, w2, b2)
    assert out.shape == (batch, 1)
    assert jnp.allclose(out, ref, atol=1e-5, rtol=1e-5)

    # --- larger, non-multiple batch to exercise the tiled/padded grid path ---
    batch2, input_size2 = 1000, 64
    x2 = jax.random.normal(k_x2, (batch2, input_size2), jnp.float32)
    w1b, b1b, w2b, b2b = init_params(input_size2, k_p)

    out2 = net_forward(x2, w1b, b1b, w2b, b2b, bm=512)
    jax.block_until_ready(out2)
    ref2 = _reference(x2, w1b, b1b, w2b, b2b)
    assert out2.shape == (batch2, 1)
    assert jnp.allclose(out2, ref2, atol=1e-5, rtol=1e-5)

    print("KERNEL_OK")
</pallas_src>

<mosaic_0001>
module attributes {stable_mosaic.version = 11 : i64} {
  func.func @mlp_kernel(%arg0: i32, %arg1: memref<8x32xf32, #tpu.memory_space<vmem>>, %arg2: memref<32x2xf32, #tpu.memory_space<vmem>>, %arg3: memref<2xf32, #tpu.memory_space<smem>>, %arg4: memref<2xf32, #tpu.memory_space<smem>>, %arg5: memref<1xf32, #tpu.memory_space<smem>>, %arg6: memref<8x1xf32, #tpu.memory_space<vmem>>) attributes {dimension_semantics = [#tpu.dimension_semantics<parallel>], iteration_bounds = array<i64: 1>, scalar_prefetch = 0 : i64, scratch_operands = 0 : i64, tpu.core_type = #tpu.core_type<tc>, window_params = [{transform_indices = @transform_0, window_bounds = array<i64: 8, 32>}, {pipeline_mode = #tpu.pipeline_mode<synchronous>, transform_indices = @transform_1, window_bounds = array<i64: 32, 2>}, {transform_indices = @transform_2, window_bounds = array<i64: 2>}, {transform_indices = @transform_3, window_bounds = array<i64: 2>}, {transform_indices = @transform_4, window_bounds = array<i64: 1>}, {transform_indices = @transform_5, window_bounds = array<i64: 8, 1>}]} {
    %c0 = arith.constant 0 : index
    %c0_0 = arith.constant 0 : index
    %0 = vector.load %arg1[%c0, %c0_0] : memref<8x32xf32, #tpu.memory_space<vmem>>, vector<8x32xf32>
    %c0_1 = arith.constant 0 : index
    %c0_2 = arith.constant 0 : index
    %1 = vector.load %arg2[%c0_1, %c0_2] : memref<32x2xf32, #tpu.memory_space<vmem>>, vector<32x2xf32>
    %cst = arith.constant dense<0.000000e+00> : vector<8x2xf32>
    %2 = tpu.matmul %0, %1, %cst {dimension_numbers = #tpu.dot_dimension_numbers<[1], [0], [0], [1], [0, 0, 1, 1], [], []>} : vector<8x32xf32>, vector<32x2xf32>, vector<8x2xf32> -> vector<8x2xf32>
    %3 = vector.extract_strided_slice %2 {offsets = [0, 0], sizes = [8, 1], strides = [1, 1]} : vector<8x2xf32> to vector<8x1xf32>
    %c0_3 = arith.constant 0 : index
    %4 = memref.load %arg3[%c0_3] : memref<2xf32, #tpu.memory_space<smem>>
    %5 = vector.broadcast %4 : f32 to vector<8x1xf32>
    %6 = arith.addf %3, %5 : vector<8x1xf32>
    %cst_4 = arith.constant 0.000000e+00 : f32
    %7 = vector.broadcast %cst_4 : f32 to vector<8x1xf32>
    %8 = arith.maximumf %6, %7 : vector<8x1xf32>
    %9 = vector.extract_strided_slice %2 {offsets = [0, 1], sizes = [8, 1], strides = [1, 1]} : vector<8x2xf32> to vector<8x1xf32>
    %c1 = arith.constant 1 : index
    %10 = memref.load %arg3[%c1] : memref<2xf32, #tpu.memory_space<smem>>
    %11 = vector.broadcast %10 : f32 to vector<8x1xf32>
    %12 = arith.addf %9, %11 : vector<8x1xf32>
    %cst_5 = arith.constant 0.000000e+00 : f32
    %13 = vector.broadcast %cst_5 : f32 to vector<8x1xf32>
    %14 = arith.maximumf %12, %13 : vector<8x1xf32>
    %c0_6 = arith.constant 0 : index
    %15 = memref.load %arg4[%c0_6] : memref<2xf32, #tpu.memory_space<smem>>
    %16 = vector.broadcast %15 : f32 to vector<8x1xf32>
    %17 = arith.mulf %8, %16 : vector<8x1xf32>
    %c1_7 = arith.constant 1 : index
    %18 = memref.load %arg4[%c1_7] : memref<2xf32, #tpu.memory_space<smem>>
    %19 = vector.broadcast %18 : f32 to vector<8x1xf32>
    %20 = arith.mulf %14, %19 : vector<8x1xf32>
    %21 = arith.addf %17, %20 : vector<8x1xf32>
    %c0_8 = arith.constant 0 : index
    %22 = memref.load %arg5[%c0_8] : memref<1xf32, #tpu.memory_space<smem>>
    %23 = vector.broadcast %22 : f32 to vector<8x1xf32>
    %24 = arith.addf %21, %23 : vector<8x1xf32>
    %c0_9 = arith.constant 0 : index
    %c0_10 = arith.constant 0 : index
    %25 = vector.load %arg6[%c0_9, %c0_10] : memref<8x1xf32, #tpu.memory_space<vmem>>, vector<8x1xf32>
    tpu.vector_store %arg6[%c0_9, %c0_10], %24 {strides = array<i32>} : memref<8x1xf32, #tpu.memory_space<vmem>>, vector<8x1xf32>,
    return
  }
  func.func @transform_0(%arg0: i32) -> (i32, i32) {
    %c0_i32 = arith.constant 0 : i32
    %c0_i32_0 = arith.constant 0 : i32
    return %arg0, %c0_i32 : i32, i32
  }
  func.func @transform_1(%arg0: i32) -> (i32, i32) {
    %c0_i32 = arith.constant 0 : i32
    %c0_i32_0 = arith.constant 0 : i32
    %c0_i32_1 = arith.constant 0 : i32
    return %c0_i32, %c0_i32_0 : i32, i32
  }
  func.func @transform_2(%arg0: i32) -> i32 {
    %c0_i32 = arith.constant 0 : i32
    %c0_i32_0 = arith.constant 0 : i32
    return %c0_i32 : i32
  }
  func.func @transform_3(%arg0: i32) -> i32 {
    %c0_i32 = arith.constant 0 : i32
    %c0_i32_0 = arith.constant 0 : i32
    return %c0_i32 : i32
  }
  func.func @transform_4(%arg0: i32) -> i32 {
    %c0_i32 = arith.constant 0 : i32
    %c0_i32_0 = arith.constant 0 : i32
    return %c0_i32 : i32
  }
  func.func @transform_5(%arg0: i32) -> (i32, i32) {
    %c0_i32 = arith.constant 0 : i32
    %c0_i32_0 = arith.constant 0 : i32
    return %arg0, %c0_i32 : i32, i32
  }
}

</mosaic_0001>

<bundles_post_ra>
// kernel: tpu_custom_call.1
= control target key start
LH: loop header
LB: loop body
LE: loop exit
PB: predicated region body
PF: predicated region fallthrough
CT: control target
= control target key end

     0   :  { %11 = vsyncpa [#allocation4], 0  ;;  %s277_s0 = inlined_call_operand.vmem [shape: f32[8,32], index: 0, kind: input, shape index: {}]   ;;  %s278_s1 = inlined_call_operand.vmem [shape: f32[32,2], index: 1, kind: input, shape index: {}]   ;;  %s279_s2 = inlined_call_operand.vmem [shape: f32[2], index: 2, kind: input, shape index: {}]   ;;  %s280_s3 = inlined_call_operand.vmem [shape: f32[2], index: 3, kind: input, shape index: {}]   ;;  %s281_s4 = inlined_call_operand.<no memory space> [shape: f32[1], index: 4, kind: input, shape index: {}]   ;;  %s282_s5 = inlined_call_operand.vmem [shape: f32[8,1], index: 5, kind: output, shape index: {}]  }
   0x1   :  { %s23_s20 = sshll.u32 %s279_s2, 4  ;;  %s24_s20 = int_to_ptr.vmem [resolvable:$true] %s23_s20 }
   0x2   :  { %12 = vsyncpa [#allocation6], 0  ;;  %s33_s23 = sshll.u32 %s280_s3, 4  ;;  %s186_s24 = scalar_lea.vmem %s24_s20, 16  ;;  %s34_s23 = int_to_ptr.vmem [resolvable:$true] %s33_s23 }
   0x3   :  { %p187_p0 = scmp.ne.s32.totalorder %s24_s20, %s186_s24  ;;  %p191_p1 = scmp.lt.s32.totalorder %s24_s20, %s24_s20 }
   0x4   :  { %p192_p2 = scmp.lt.s32.totalorder %s186_s24, %s186_s24 }
   0x6   :  { %p193_p3 = por %p192_p2, %p191_p1 }
   0x8   :  { %p194_p4 = pnand %p193_p3, %p187_p0 }
   0xa   :  { %197 = shalt.err (!%p194_p4)
}
   0xb   :  { %s214_s25 = smov [#allocation3]   ;;  %s198_s26 = scalar_lea.vmem %s34_s23, 16 }
   0xc   :  { %26 = dma.vmem_to_smem %s24_s20, 16, %s214_s25, [#allocation4]  }
   0xd   :  { %p199_p5 = scmp.ne.s32.totalorder %s34_s23, %s198_s26  ;;  %p203_p6 = scmp.lt.s32.totalorder %s34_s23, %s34_s23 }
   0xe   :  { %p204_p7 = scmp.lt.s32.totalorder %s198_s26, %s198_s26 }
  0x10   :  { %p205_p8 = por %p204_p7, %p203_p6 }
  0x12   :  { %p206_p9 = pnand %p205_p8, %p199_p5 }
  0x14   :  { %209 = shalt.err (!%p206_p9)
}
  0x15   :  { %s215_s2 = smov [#allocation5]  }
  0x16   :  { %36 = dma.vmem_to_smem %s34_s23, 16, %s215_s2, [#allocation6]  }
  0x17   :  { %210 = dma.done.wait [#allocation4], 16  }
  0x18   :  { %211 = vsyncadd [#allocation4], 4294967280 }
  0x19   :  { %212 = dma.done.wait [#allocation6], 16  }
  0x1a   :  { %213 = vsyncadd [#allocation6], 4294967280 }
  0x1b   :  { %45 = sfence }
  0x1c   :  { %v47_v0 = vld [vmem:[%s278_s1] sm:$0xff]  ;;  %v48_v1 = vld [vmem:[%s278_s1 + $0x8] sm:$0xff]  ;;  %v49_v2 = vld [vmem:[%s278_s1 + $0x10] sm:$0xff]  ;;  %v216_v3 = vmov 0.0|0.0   ;;  %vm217_vm0 = vmmov 0   ;;  %v218_v6 = vmov 0.0   ;;  %v145_v22 = vstv %s281_s4 }
  0x1d   :  { %174 = vmatprep.subr.bf16.mxu0 %v216_v3  ;;  %v175_v4 = vpack.c.bf16 %v48_v1, %v47_v0  ;;  %v50_v5 = vld [vmem:[%s278_s1 + $0x18] sm:$0xff]  ;;  %171 = vmatprep.mubr.msk.f32.mxu0 %vm217_vm0, %v218_v6  ;;  %v46_v8 = vld [vmem:[%s277_s0] sm:$0xff]  ;;  %vm51_vm1 = vcmask 261120   ;;  %s156_s11 = sld [smem:[#allocation3 + $0x1]]  ;;  %s219_s1 = smov 127   ;;  %vm147_vm2 = vcmask 7168  }
  0x1e   :  { %v178_v7 = vpack.c.bf16 %v50_v5, %v49_v2  ;;  %s157_s12 = sld [smem:[#allocation5 + $0x1]]  ;;  %s125_s13 = sld [smem:[#allocation3]] }
  0x1f   :  { %176 = vmatpush3.bf16.msra.mxu0 %v175_v4  ;;  %s133_s14 = sld [smem:[#allocation5]] }
  0x20   :  { %177 = vmatprep.subr.bf16.mxu0 %v216_v3 }
  0x23   :  { %179 = vmatpush3.bf16.msra.mxu0 %v178_v7  ;;  %v130_v9 = vstv %s156_s11 }
  0x24   :  { %v137_v13 = vstv %s157_s12  ;;  %v126_v16 = vstv %s125_s13 }
  0x25   :  { %v134_v19 = vstv %s133_s14 }
  0x26   :  { %172 = vmatmul.mubr.msk.f32.vlgmr.msra.gmra.mrb[0].mxu0 %vm51_vm1, %v46_v8 }
  0xf9   :  { %v121_v10 = vpop.f32.mrb[0].mxu0 }
  0xfa   :  { %v131_v11 = vadd.f32 %v130_v9, %v121_v10  ;;  %v173_v12 = vpop.f32.mrb[1].mxu0  ;;  %v127_v17 = vadd.f32 %v126_v16, %v121_v10 }
  0xfc   :  { %v132_v14 = vmax.f32 %v131_v11, 0.0  ;;  %v128_v18 = vmax.f32 %v127_v17, 0.0 }
  0xfe   :  { %v138_v15 = vmul.f32 %v137_v13, %v132_v14  ;;  %v135_v20 = vmul.f32 %v134_v19, %v128_v18 }
 0x100   :  { %140 = vrot.lane.b32.xlu0 %v138_v15, %s219_s1 }
 0x172   :  { %v141_v21 = vpop.permute.xlu0 %140 }
 0x173   :  { %v143_v23 = vadd.f32 %v141_v21, %v135_v20 }
 0x175   :  { %v146_v24 = vadd.f32 %v145_v22, %v143_v23 }
 0x177   :  { %148 = vst.msk [vmem:[%s282_s5] sm:$0xff] %vm147_vm2, %v146_v24 }
 0x178   :  { %153 = vsyncpa [#allocation4], 1 }
 0x179   :  { %154 = vsyncpa [#allocation6], 1 }

</bundles_post_ra>
